<compile_context>
chip_gen: v7x
topology: tpu7x:2x2x1
jax: 0.10.0
libtpu: 0.0.40
codegen_flags: <defaults>
</compile_context>

<pallas_src>
import jax
import jax.numpy as jnp
import numpy as np
from jax.experimental import pallas as pl
from jax.experimental.pallas import tpu as pltpu

BN_EPS = 1e-5
CLIP_MIN, CLIP_MAX = 0.0, 20.0           # Hardtanh(0, 20)
MXU_DTYPE = jnp.bfloat16                 # matmul operand dtype (f32 accumulate)

_COMPILER_PARAMS = pltpu.CompilerParams(
    dimension_semantics=("parallel",),   # one image per step -> megacore-shardable
    vmem_limit_bytes=32 * 1024 * 1024,   # safe on v5e/v6e (128 MiB) and v7x (64 MiB)
)


# --------------------------------------------------------------------------
# Conv core: 3x3, stride=1, pad=1 on one image's packed "super-rows".
#   a      : (R, L) activation super-rows, L = pack*W*C, dtype MXU_DTYPE
#   m_ref  : (3, L, L) banded weight matrices for super-row offsets -1 / 0 / +1
#   y_ref  : (1, R, L) f32 raw conv output
#   st_ref : (1, 2, L) f32 per-image partial BN stats [sum ; sum of squares]
# --------------------------------------------------------------------------
def _conv_core(a, m_ref, y_ref, st_ref):
    zrow = jnp.zeros((1, a.shape[1]), a.dtype)
    a_dn = jnp.concatenate([zrow, a[:-1]], axis=0)    # super-row r-1 (zero at top)
    a_up = jnp.concatenate([a[1:], zrow], axis=0)     # super-row r+1 (zero at bottom)
    # Pure chained accumulation (MRB in-place accumulate on v7x).
    acc = jnp.dot(a_dn, m_ref[0], preferred_element_type=jnp.float32)
    acc += jnp.dot(a, m_ref[1], preferred_element_type=jnp.float32)
    acc += jnp.dot(a_up, m_ref[2], preferred_element_type=jnp.float32)
    y_ref[0, :, :] = acc
    # Single-pass partial BN stats in f32 (folded to per-channel in XLA).
    # NOTE: E[x^2]-mean^2 is benign at these magnitudes; use a shifted/Welford
    # accumulation if activations ever carry a large common mean.
    st_ref[0, 0:1, :] = jnp.sum(acc, axis=0, keepdims=True)
    st_ref[0, 1:2, :] = jnp.sum(acc * acc, axis=0, keepdims=True)


def _conv1_kernel(x_ref, m_ref, y_ref, st_ref):
    _conv_core(x_ref[0].astype(MXU_DTYPE), m_ref, y_ref, st_ref)


def _conv2_kernel(y1_ref, sc_ref, sh_ref, m_ref, y_ref, st_ref):
    # Fused BN1 affine + Hardtanh prologue (f32), then cast for the MXU.
    a = jnp.clip(y1_ref[0] * sc_ref[...] + sh_ref[...], CLIP_MIN, CLIP_MAX)
    _conv_core(a.astype(MXU_DTYPE), m_ref, y_ref, st_ref)


def _bn_res_act_kernel(y2_ref, sc_ref, sh_ref, res_ref, o_ref):
    out = y2_ref[0] * sc_ref[...] + sh_ref[...] + res_ref[0]
    o_ref[0, :, :] = jnp.clip(out, CLIP_MIN, CLIP_MAX)


# --------------------------------------------------------------------------
# pallas_call wrappers
# --------------------------------------------------------------------------
def _conv_stage(act, banded, scale=None, shift=None):
    """One conv3x3 stage over all images -> (raw conv rows, per-image stats)."""
    n, r, l = act.shape
    img_spec = pl.BlockSpec((1, r, l), lambda i: (i, 0, 0))
    wgt_spec = pl.BlockSpec(banded.shape, lambda i: (0, 0, 0))   # resident weights
    vec_spec = pl.BlockSpec((1, l), lambda i: (0, 0))            # resident scale/shift
    if scale is None:
        kern, in_specs, args = _conv1_kernel, [img_spec, wgt_spec], (act, banded)
    else:
        kern = _conv2_kernel
        in_specs = [img_spec, vec_spec, vec_spec, wgt_spec]
        args = (act, scale, shift, banded)
    return pl.pallas_call(
        kern,
        out_shape=(jax.ShapeDtypeStruct((n, r, l), jnp.float32),
                   jax.ShapeDtypeStruct((n, 2, l), jnp.float32)),
        grid_spec=pltpu.PrefetchScalarGridSpec(
            num_scalar_prefetch=0,
            grid=(n,),
            in_specs=in_specs,
            out_specs=(pl.BlockSpec((1, r, l), lambda i: (i, 0, 0)),
                       pl.BlockSpec((1, 2, l), lambda i: (i, 0, 0))),
        ),
        compiler_params=_COMPILER_PARAMS,
    )(*args)


def _bn_res_act(y2, scale, shift, res):
    n, r, l = y2.shape
    img_spec = pl.BlockSpec((1, r, l), lambda i: (i, 0, 0))
    vec_spec = pl.BlockSpec((1, l), lambda i: (0, 0))
    return pl.pallas_call(
        _bn_res_act_kernel,
        out_shape=jax.ShapeDtypeStruct((n, r, l), jnp.float32),
        grid_spec=pltpu.PrefetchScalarGridSpec(
            num_scalar_prefetch=0,
            grid=(n,),
            in_specs=[img_spec, vec_spec, vec_spec, img_spec],
            out_specs=img_spec,
        ),
        compiler_params=_COMPILER_PARAMS,
    )(y2, scale, shift, res)


# --------------------------------------------------------------------------
# Host-side prep (tiny, runs once per call in plain XLA)
# --------------------------------------------------------------------------
def _packed_banded(w_oihw, width, pack):
    """PyTorch (Cout, Cin, 3, 3) -> (3, pack*W*Cin, pack*W*Cout) matrices M[s]
    (s = -1, 0, +1) such that, with super-rows X[r] = rows [r*pack, r*pack+pack)
    lane-concatenated,  out_super[r] = X[r-1] @ M[-1] + X[r] @ M[0] + X[r+1] @ M[+1]
    equals the 'SAME' 3x3 convolution.  Width zero-padding is encoded by the
    truncated shifted identities, so activations never need padding in HBM."""
    c_out, c_in, kh, kw = w_oihw.shape
    # Per-kernel-row banded matrices on un-padded width: row of W*Cin -> W*Cout.
    b = []
    for dy in range(kh):
        m = jnp.zeros((width * c_in, width * c_out), jnp.float32)
        for dx in range(kw):
            shift = jnp.eye(width, width, k=1 - dx, dtype=jnp.float32)
            tap = jnp.transpose(w_oihw[:, :, dy, dx]).astype(jnp.float32)  # (Cin, Cout)
            m = m + jnp.kron(shift, tap)
        b.append(m)
    zero = jnp.zeros_like(b[0])
    mats = []
    for s in (-1, 0, 1):
        rows = []
        for p_in in range(pack):
            cols = []
            for p_out in range(pack):
                dy = p_in - p_out + 1 + s * pack
                cols.append(b[dy] if 0 <= dy < kh else zero)
            rows.append(jnp.concatenate(cols, axis=1))
        mats.append(jnp.concatenate(rows, axis=0))
    return jnp.stack(mats, axis=0)


def _finalize_bn(stats, gamma, beta, count, c_out):
    """Per-image partial stats -> per-lane BN scale/shift row vectors."""
    tot = jnp.sum(stats, axis=0)                                  # (2, L)
    lanes = tot.shape[1]
    per_c = tot.reshape(2, lanes // c_out, c_out).sum(axis=1)     # (2, Cout)
    mean = per_c[0] / count
    var = per_c[1] / count - mean * mean                          # biased (training fwd)
    inv = jax.lax.rsqrt(var + BN_EPS)
    scale = gamma.astype(jnp.float32) * inv
    shift = beta.astype(jnp.float32) - mean * scale
    scale_l = jnp.tile(scale, lanes // c_out).reshape(1, lanes)
    shift_l = jnp.tile(shift, lanes // c_out).reshape(1, lanes)
    return scale_l, shift_l


# --------------------------------------------------------------------------
# BasicBlock forward (inplanes == planes, stride=1, downsample=None)
# --------------------------------------------------------------------------
def basic_block_forward(x_nchw, params):
    n, c, h, w = x_nchw.shape
    c_out = params["w1"].shape[0]
    assert c_out == c and params["w1"].shape[1] == c, \
        "only inplanes == planes, stride=1, no downsample is supported"

    # Pack image rows so the lane dimension is >= 128 (lane-dense loads/stores).
    pack = max(1, -(-128 // (w * c)))
    while h % pack:
        pack -= 1
    lanes = pack * w * c
    r = h // pack

    x_sup = jnp.transpose(x_nchw, (0, 2, 3, 1)).astype(jnp.float32)   # NHWC
    x_sup = x_sup.reshape(n, r, lanes)                                # (N, H/pack, pack*W*C)
    count = float(n * h * w)

    m1 = _packed_banded(params["w1"], w, pack).astype(MXU_DTYPE)
    m2 = _packed_banded(params["w2"], w, pack).astype(MXU_DTYPE)

    # Stage 1: conv1 + partial BN stats (single read of x).
    y1_raw, st1 = _conv_stage(x_sup, m1)
    sc1, sh1 = _finalize_bn(st1, params["gamma1"], params["beta1"], count, c)

    # Stage 2: BN1 affine + Hardtanh fused into the conv2 prologue, then conv2 + stats.
    y2_raw, st2 = _conv_stage(y1_raw, m2, sc1, sh1)
    sc2, sh2 = _finalize_bn(st2, params["gamma2"], params["beta2"], count, c)

    # Stage 3: BN2 affine + residual + Hardtanh.
    out_sup = _bn_res_act(y2_raw, sc2, sh2, x_sup)

    out = out_sup.reshape(n, h, w, c)
    return jnp.transpose(out, (0, 3, 1, 2))                          # NHWC -> NCHW


# --------------------------------------------------------------------------
# Pure-JAX f32 reference (for verification)
# --------------------------------------------------------------------------
def _ref_forward(x_nchw, params):
    x = jnp.transpose(x_nchw, (0, 2, 3, 1)).astype(jnp.float32)

    def conv(t, w_oihw):
        w_hwio = jnp.transpose(w_oihw, (2, 3, 1, 0))
        return jax.lax.conv_general_dilated(
            t, w_hwio, (1, 1), "SAME",
            dimension_numbers=("NHWC", "HWIO", "NHWC"),
            precision=jax.lax.Precision.HIGHEST)

    def bn(t, g, b):
        m = jnp.mean(t, axis=(0, 1, 2), keepdims=True)
        v = jnp.mean((t - m) ** 2, axis=(0, 1, 2), keepdims=True)
        return (t - m) * jax.lax.rsqrt(v + BN_EPS) * g.reshape(1, 1, 1, -1) \
            + b.reshape(1, 1, 1, -1)

    act = lambda t: jnp.clip(t, CLIP_MIN, CLIP_MAX)
    y = act(bn(conv(x, params["w1"]), params["gamma1"], params["beta1"]))
    o = bn(conv(y, params["w2"]), params["gamma2"], params["beta2"]) + x
    return jnp.transpose(act(o), (0, 3, 1, 2))


if __name__ == "__main__":
    key = jax.random.PRNGKey(0)
    kx, k1, k2 = jax.random.split(key, 3)

    N, C, H, W = 2, 4, 16, 16  # inplanes = planes = 4, stride = 1
    x = jax.random.normal(kx, (N, C, H, W), jnp.float32)

    params = {
        # conv3x3 weights, PyTorch layout (Cout, Cin, 3, 3), bias=False
        "w1": 0.2 * jax.random.normal(k1, (C, C, 3, 3), jnp.float32),
        "w2": 0.2 * jax.random.normal(k2, (C, C, 3, 3), jnp.float32),
        # BatchNorm2d default init: weight=1, bias=0
        "gamma1": jnp.ones((C,), jnp.float32),
        "beta1": jnp.zeros((C,), jnp.float32),
        "gamma2": jnp.ones((C,), jnp.float32),
        "beta2": jnp.zeros((C,), jnp.float32),
    }

    out = jax.block_until_ready(basic_block_forward(x, params))
    ref = jax.block_until_ready(_ref_forward(x, params))

    assert out.shape == (N, C, H, W) and out.dtype == jnp.float32
    # Tolerance sized for bf16 MXU operands (f32 accumulation) vs f32 reference.
    if not np.allclose(np.asarray(out), np.asarray(ref), atol=5e-2, rtol=5e-2):
        raise SystemExit("numerical mismatch vs reference")
    print("KERNEL_OK")
</pallas_src>

<mosaic_0001>
module attributes {stable_mosaic.version = 11 : i64} {
  func.func @_conv1_kernel(%arg0: i32, %arg1: memref<1x8x128xf32, #tpu.memory_space<vmem>>, %arg2: memref<3x128x128xbf16, #tpu.memory_space<vmem>>, %arg3: memref<1x8x128xf32, #tpu.memory_space<vmem>>, %arg4: memref<1x2x128xf32, #tpu.memory_space<vmem>>) attributes {dimension_semantics = [#tpu.dimension_semantics<parallel>], iteration_bounds = array<i64: 2>, scalar_prefetch = 0 : i64, scratch_operands = 0 : i64, tpu.core_type = #tpu.core_type<tc>, window_params = [{transform_indices = @transform_0, window_bounds = array<i64: 1, 8, 128>}, {pipeline_mode = #tpu.pipeline_mode<synchronous>, transform_indices = @transform_1, window_bounds = array<i64: 3, 128, 128>}, {transform_indices = @transform_2, window_bounds = array<i64: 1, 8, 128>}, {transform_indices = @transform_3, window_bounds = array<i64: 1, 2, 128>}]} {
    %c0 = arith.constant 0 : index
    %c0_0 = arith.constant 0 : index
    %c0_1 = arith.constant 0 : index
    %0 = vector.load %arg1[%c0, %c0_0, %c0_1] : memref<1x8x128xf32, #tpu.memory_space<vmem>>, vector<1x8x128xf32>
    %1 = vector.shape_cast %0 : vector<1x8x128xf32> to vector<8x128xf32>
    %2 = arith.truncf %1 : vector<8x128xf32> to vector<8x128xbf16>
    %cst = arith.constant 0.000000e+00 : bf16
    %3 = vector.broadcast %cst : bf16 to vector<1x128xbf16>
    %4 = vector.extract_strided_slice %2 {offsets = [0, 0], sizes = [7, 128], strides = [1, 1]} : vector<8x128xbf16> to vector<7x128xbf16>
    %5 = tpu.concatenate %3, %4 in 0 : vector<1x128xbf16>, vector<7x128xbf16> -> vector<8x128xbf16>
    %6 = vector.extract_strided_slice %2 {offsets = [1, 0], sizes = [7, 128], strides = [1, 1]} : vector<8x128xbf16> to vector<7x128xbf16>
    %7 = tpu.concatenate %6, %3 in 0 : vector<7x128xbf16>, vector<1x128xbf16> -> vector<8x128xbf16>
    %c0_2 = arith.constant 0 : index
    %c0_3 = arith.constant 0 : index
    %c0_4 = arith.constant 0 : index
    %8 = vector.load %arg2[%c0_2, %c0_3, %c0_4] : memref<3x128x128xbf16, #tpu.memory_space<vmem>>, vector<1x128x128xbf16>
    %9 = vector.shape_cast %8 : vector<1x128x128xbf16> to vector<128x128xbf16>
    %cst_5 = arith.constant dense<0.000000e+00> : vector<8x128xf32>
    %10 = tpu.matmul %5, %9, %cst_5 {dimension_numbers = #tpu.dot_dimension_numbers<[1], [0], [0], [1], [0, 0, 1, 1], [], []>} : vector<8x128xbf16>, vector<128x128xbf16>, vector<8x128xf32> -> vector<8x128xf32>
    %c1 = arith.constant 1 : index
    %c0_6 = arith.constant 0 : index
    %c0_7 = arith.constant 0 : index
    %11 = vector.load %arg2[%c1, %c0_6, %c0_7] : memref<3x128x128xbf16, #tpu.memory_space<vmem>>, vector<1x128x128xbf16>
    %12 = vector.shape_cast %11 : vector<1x128x128xbf16> to vector<128x128xbf16>
    %cst_8 = arith.constant dense<0.000000e+00> : vector<8x128xf32>
    %13 = tpu.matmul %2, %12, %cst_8 {dimension_numbers = #tpu.dot_dimension_numbers<[1], [0], [0], [1], [0, 0, 1, 1], [], []>} : vector<8x128xbf16>, vector<128x128xbf16>, vector<8x128xf32> -> vector<8x128xf32>
    %14 = arith.addf %10, %13 : vector<8x128xf32>
    %c2 = arith.constant 2 : index
    %c0_9 = arith.constant 0 : index
    %c0_10 = arith.constant 0 : index
    %15 = vector.load %arg2[%c2, %c0_9, %c0_10] : memref<3x128x128xbf16, #tpu.memory_space<vmem>>, vector<1x128x128xbf16>
    %16 = vector.shape_cast %15 : vector<1x128x128xbf16> to vector<128x128xbf16>
    %cst_11 = arith.constant dense<0.000000e+00> : vector<8x128xf32>
    %17 = tpu.matmul %7, %16, %cst_11 {dimension_numbers = #tpu.dot_dimension_numbers<[1], [0], [0], [1], [0, 0, 1, 1], [], []>} : vector<8x128xbf16>, vector<128x128xbf16>, vector<8x128xf32> -> vector<8x128xf32>
    %18 = arith.addf %14, %17 : vector<8x128xf32>
    %c0_12 = arith.constant 0 : index
    %c0_13 = arith.constant 0 : index
    %c0_14 = arith.constant 0 : index
    %19 = vector.load %arg3[%c0_12, %c0_13, %c0_14] : memref<1x8x128xf32, #tpu.memory_space<vmem>>, vector<1x8x128xf32>
    %20 = vector.shape_cast %19 : vector<1x8x128xf32> to vector<8x128xf32>
    %21 = vector.shape_cast %18 : vector<8x128xf32> to vector<1x8x128xf32>
    tpu.vector_store %arg3[%c0_12, %c0_13, %c0_14], %21 {strides = array<i32>} : memref<1x8x128xf32, #tpu.memory_space<vmem>>, vector<1x8x128xf32>,
    %cst_15 = arith.constant dense<0.000000e+00> : vector<128xf32>
    %22 = vector.multi_reduction <add>, %18, %cst_15 [0] : vector<8x128xf32> to vector<128xf32>
    %23 = vector.shape_cast %22 : vector<128xf32> to vector<1x128xf32>
    %c0_16 = arith.constant 0 : index
    %c0_17 = arith.constant 0 : index
    %c0_18 = arith.constant 0 : index
    %24 = vector.load %arg4[%c0_16, %c0_17, %c0_18] : memref<1x2x128xf32, #tpu.memory_space<vmem>>, vector<1x1x128xf32>
    %25 = vector.shape_cast %24 : vector<1x1x128xf32> to vector<1x128xf32>
    %26 = vector.shape_cast %23 : vector<1x128xf32> to vector<1x1x128xf32>
    tpu.vector_store %arg4[%c0_16, %c0_17, %c0_18], %26 {strides = array<i32>} : memref<1x2x128xf32, #tpu.memory_space<vmem>>, vector<1x1x128xf32>,
    %27 = arith.mulf %18, %18 : vector<8x128xf32>
    %cst_19 = arith.constant dense<0.000000e+00> : vector<128xf32>
    %28 = vector.multi_reduction <add>, %27, %cst_19 [0] : vector<8x128xf32> to vector<128xf32>
    %29 = vector.shape_cast %28 : vector<128xf32> to vector<1x128xf32>
    %c0_20 = arith.constant 0 : index
    %c1_21 = arith.constant 1 : index
    %c0_22 = arith.constant 0 : index
    %30 = vector.load %arg4[%c0_20, %c1_21, %c0_22] : memref<1x2x128xf32, #tpu.memory_space<vmem>>, vector<1x1x128xf32>
    %31 = vector.shape_cast %30 : vector<1x1x128xf32> to vector<1x128xf32>
    %32 = vector.shape_cast %29 : vector<1x128xf32> to vector<1x1x128xf32>
    tpu.vector_store %arg4[%c0_20, %c1_21, %c0_22], %32 {strides = array<i32>} : memref<1x2x128xf32, #tpu.memory_space<vmem>>, vector<1x1x128xf32>,
    return
  }
  func.func @transform_0(%arg0: i32) -> (i32, i32, i32) {
    %c0_i32 = arith.constant 0 : i32
    %c0_i32_0 = arith.constant 0 : i32
    %c0_i32_1 = arith.constant 0 : i32
    return %arg0, %c0_i32, %c0_i32_0 : i32, i32, i32
  }
  func.func @transform_1(%arg0: i32) -> (i32, i32, i32) {
    %c0_i32 = arith.constant 0 : i32
    %c0_i32_0 = arith.constant 0 : i32
    %c0_i32_1 = arith.constant 0 : i32
    %c0_i32_2 = arith.constant 0 : i32
    return %c0_i32, %c0_i32_0, %c0_i32_1 : i32, i32, i32
  }
  func.func @transform_2(%arg0: i32) -> (i32, i32, i32) {
    %c0_i32 = arith.constant 0 : i32
    %c0_i32_0 = arith.constant 0 : i32
    %c0_i32_1 = arith.constant 0 : i32
    return %arg0, %c0_i32, %c0_i32_0 : i32, i32, i32
  }
  func.func @transform_3(%arg0: i32) -> (i32, i32, i32) {
    %c0_i32 = arith.constant 0 : i32
    %c0_i32_0 = arith.constant 0 : i32
    %c0_i32_1 = arith.constant 0 : i32
    return %arg0, %c0_i32, %c0_i32_0 : i32, i32, i32
  }
}

</mosaic_0001>

<bundles_post_ra>
// kernel: tpu_custom_call.1
= control target key start
LH: loop header
LB: loop body
LE: loop exit
PB: predicated region body
PF: predicated region fallthrough
CT: control target
= control target key end

     0   :  { %9 = vsyncpa [#allocation3], 0  ;;  %s1388_s0 = inlined_call_operand.hbm [shape: f32[2,8,128], index: 0, kind: input, shape index: {}]   ;;  %s1389_s1 = inlined_call_operand.hbm [shape: bf16[3,128,128], index: 1, kind: input, shape index: {}]   ;;  %s1390_s2 = inlined_call_operand.hbm [shape: f32[2,8,128], index: 2, kind: output, shape index: {0}]   ;;  %s1391_s3 = inlined_call_operand.hbm [shape: f32[2,2,128], index: 3, kind: output, shape index: {1}]  }
   0x1   :  { %11 = vsyncpa [#allocation3 + $0x1], 0 }
   0x2   :  { %12 = vsyncpa [#allocation6], 0 }
   0x3   :  { %13 = vsyncpa [#allocation4], 0 }
   0x4   :  { %15 = vsyncpa [#allocation4 + $0x1], 0 }
   0x5   :  { %16 = vsyncpa [#allocation9], 0 }
   0x6   :  { %18 = vsyncpa [#allocation9 + $0x1], 0  ;;  %s1122_s12 = smov 0   ;;  %s1124_s13 = smov 0  }
   0x7   :  { %s1126_s14 = smov 0   ;;  %s1128_s15 = smov 0  }
   0x8 LB: > { %s1143_s16 = sadd.s32 4294967295, %s1092_s15   ;;  %s709_s17 = sadd.s32 4294967294, %s1092_s15   ;;  %s1092_s15 = sphi %s1128_s15, %s1411_s15   ;;  %s1088_s14 = sphi %s1126_s14, %s1410_s14   ;;  %s1084_s13 = sphi %s1124_s13, %s1409_s13   ;;  %s1080_s12 = sphi %s1122_s12, %s1408_s12  }
   0x9   : > { %p44_p0 = scmp.ne.s32.totalorder %s1084_s13, %s1080_s12  ;;  %p1392_p1 = scmp.eq.s32.totalorder %s1143_s16, 0 }
   0xa   : > { %p95_p3 = scmp.eq.s32.totalorder %s709_s17, 1  ;;  %p710_p5 = scmp.ge.s32.totalorder %s1092_s15, 1 }
   0xb   : > { %p1152_p4 = por %p1392_p1, %p44_p0  ;;  %p128_p7 = scmp.lt.s32.totalorder %s1092_s15, 3 }
   0xc   : > { %p1157_p6 = por %p95_p3, %p44_p0  ;;  %s1094_s21 = smov [#allocation5]  }
   0xd   : > { %s1395_s18 = scalar_select %p1152_p4, 1, 0 }
   0xe   : > { %s1396_s19 = scalar_select %p1157_p6, 1, 0 }
   0xf   : > { %p1162_p8 = pnand %p710_p5, %p128_p7  ;;  %s140_s22 = sshll.u32 %s1094_s21, 4  ;;  %s1166_s22 = int_to_ptr.vmem [resolvable:$true] %s140_s22 }
  0x10   : > { %s1178_s24 = sadd.s32 1, %s1092_s15   ;;  %s31_s25 = sadd.s32 1, %s1088_s14 }
  0x11   : > { %s1397_s20 = scalar_select %p1162_p8, 1, 0 }
  0x12   : > { %p852_p9 = pneg %p1162_p8  ;;  %s28_s26 = ssub.s32 %s1092_s15, %s1178_s24 }
  0x13   : > { %s932_s29 = scalar_lea.hbm %s1389_s1, 3072 }
  0x14   : > { %p1173_p11 = pnand %p852_p9, %p1392_p1  ;;  %p933_p12 = scmp.ne.s32.totalorder %s1389_s1, %s932_s29 }
  0x15   : > { %p939_p5 = scmp.lt.u32.totalorder %s932_s29, %s1389_s1 }
  0x16   : > { %p934_p13 = pneg %p1173_p11 }
  0x18   : > { %p935_p0 = pnand %p934_p13, %p933_p12 }
  0x1a   : > { %p936_p3 = pneg %p935_p0 }
  0x1c   : > { %p941_p7 = pnand %p939_p5, %p936_p3 }
  0x1e   : > { %944 = shalt.err (!%p941_p7)
}
  0x1f   : > { %s945_s7 = scalar_lea.vmem %s1166_s22, 3072  ;;  %p953_p2 = scmp.lt.s32.totalorder %s1166_s22, %s1166_s22 }
  0x20   : > { %p946_p9 = scmp.ne.s32.totalorder %s1166_s22, %s945_s7  ;;  %p954_p6 = scmp.lt.s32.totalorder %s945_s7, %s945_s7 }
  0x22   : > { %p948_p10 = pnand %p946_p9, %p934_p13  ;;  %p955_p4 = por %p954_p6, %p953_p2 }
  0x24   : > { %p949_p1 = pneg %p948_p10 }
  0x26   : > { %p956_p8 = pnand %p955_p4, %p949_p1 }
  0x28   : > { %959 = shalt.err (!%p956_p8)
}
  0x29   : > { %s1095_s8 = smov 64   ;;  %s1096_s9 = smov 4  }
  0x2a   : > { %855 = dma.hbm_to_vmem [thread:$0]  (!%p1173_p11), %s1389_s1, 3072, %s1166_s22, [#allocation6], %s1095_s8, %s1095_s8, %s1096_s9  }
  0x2b   : > { %p29_p2 = scmp.eq.s32.totalorder %s28_s26, 0  ;;  %p38_p1 = scmp.ne.s32.totalorder %s1088_s14, %s1084_s13 }
  0x2c   : > { %p39_p4 = scmp.eq.s32.totalorder %s1092_s15, 0  ;;  %p868_p6 = scmp.lt.s32.totalorder %s1092_s15, 2 }
  0x2d   : > { %s1209_s17 = scalar_select %p29_p2, %s1088_s14, %s31_s25  }
  0x2e   : > { %p40_p8 = por %p39_p4, %p38_p1  ;;  %p1399_p10 = scmp.eq.s32.totalorder %s1143_s16, 1 }
  0x2f   : > { %s154_s27 = sand.u32 1, %s1088_s14   ;;  %s714_s28 = sshll.u32 %s1092_s15, 7 }
  0x30   : > { %p1213_p12 = por %p1399_p10, %p38_p1  ;;  %s713_s29 = sshll.u32 %s154_s27, 3 }
  0x31   : > { %s1222_s4 = scalar_lea.hbm %s1388_s0, %s714_s28  ;;  %s158_s22 = scalar_lea.vmem [#allocation2], %s713_s29 }
  0x32   : > { %s165_s25 = sshll.u32 %s158_s22, 4  ;;  %p1224_p11 = pnand %p868_p6, %p40_p8  ;;  %s1228_s25 = int_to_ptr.vmem [resolvable:$true] %s165_s25 }
  0x33   : > { %s155_s5 = scalar_lea.sflag [#allocation3], %s154_s27  ;;  %s960_s6 = scalar_lea.hbm %s1222_s4, 128 }
  0x34   : > { %p961_p13 = scmp.ne.s32.totalorder %s1222_s4, %s960_s6  ;;  %p962_p0 = pneg %p1224_p11 }
  0x35   : > { %s965_s9 = scalar_lea.hbm %s1388_s0, 256  ;;  %p966_p7 = scmp.lt.u32.totalorder %s1222_s4, %s1388_s0 }
  0x36   : > { %p963_p3 = pnand %p962_p0, %p961_p13  ;;  %p967_p9 = scmp.lt.u32.totalorder %s965_s9, %s960_s6 }
  0x37   : > { %p969_p1 = scmp.lt.u32.totalorder %s960_s6, %s1222_s4 }
  0x38   : > { %p964_p5 = pneg %p963_p3  ;;  %p968_p2 = por %p967_p9, %p966_p7 }
  0x3a   : > { %p970_p4 = por %p969_p1, %p968_p2 }
  0x3c   : > { %p971_p6 = pnand %p970_p4, %p964_p5 }
  0x3e   : > { %974 = shalt.err (!%p971_p6)
}
  0x3f   : > { %s975_s27 = scalar_lea.vmem %s1228_s25, 128  ;;  %s1097_s28 = smov [#allocation2]  }
  0x40   : > { %p976_p8 = scmp.ne.s32.totalorder %s1228_s25, %s975_s27  ;;  %s980_s29 = sshll.u32 %s1097_s28, 4  ;;  %s981_s29 = int_to_ptr.vmem [resolvable:$false] %s980_s29 }
  0x41   : > { %s982_s23 = scalar_lea.vmem %s981_s29, 256  ;;  %p983_p3 = scmp.lt.s32.totalorder %s1228_s25, %s981_s29 }
  0x42   : > { %p978_p10 = pnand %p976_p8, %p962_p0  ;;  %p984_p7 = scmp.lt.s32.totalorder %s982_s23, %s975_s27 }
  0x44   : > { %p979_p13 = pneg %p978_p10  ;;  %p985_p9 = por %p984_p7, %p983_p3 }
  0x46   : > { %p986_p2 = pnand %p985_p9, %p979_p13 }
  0x48   : > { %989 = shalt.err (!%p986_p2)
}
  0x49   : > { %859 = dma.hbm_to_vmem [thread:$0]  (!%p1224_p11), %s1222_s4, 128, %s1228_s25, %s155_s5  }
  0x4a   : > { %p1402_p5 = scmp.ne.s32.totalorder %s1397_s20, 0 }
  0x4b   : > { %s1258_s30 = sand.u32 (!%p1402_p5), 1, %s1084_s13   ;;  %p1403_p0 = scmp.ne.s32.totalorder (!%p1402_p5), %s1395_s18, 0 }
  0x4c   : > { %174 = sbr.rel (%p1402_p5) target bundleno = 406 (0x196), region = 28  ;;  %s716_s22 = sshll.u32 (!%p1402_p5), %s1258_s30, 3 }
  0x4d   : > { %s177_s6 = scalar_lea.sflag (!%p1402_p5), [#allocation3], %s1258_s30  ;;  %s180_s7 = scalar_lea.vmem (!%p1402_p5), [#allocation2], %s716_s22 }
  0x53   : > { %1063 = dma.done.wait (%p1403_p0), %s177_s6, 128  }
  0x54   : > { %1065 = vsyncadd (%p1403_p0), %s177_s6, 4294967168  ;;  %p1404_p11 = scmp.eq.s32.totalorder %s1143_s16, 0 }
  0x56   : > { %1067 = dma.done.wait (%p1404_p11), [#allocation6], 3072   ;;  %p1405_p1 = pmov %p1404_p11 }
  0x57   : > { %v1098_v0 = vmov 0.0   ;;  %vm1099_vm0 = vmmov 0   ;;  %v908_v1 = vld [vmem:[#allocation5] sm:$0xff]   ;;  %v909_v2 = vld [vmem:[#allocation5 + $0x8] sm:$0xff]   ;;  %v910_v3 = vld [vmem:[#allocation5 + $0x10] sm:$0xff]   ;;  %vm223_vm1 = vcmask 1040384  }
  0x58   : > { %1069 = vsyncadd (%p1405_p1), [#allocation6], 4294964224  ;;  %797 = vmatprep.subr.bf16.mxu0 %v1098_v0  ;;  %777 = vmatprep.subr.bf16.mxu1 %v1098_v0  ;;  %v916_v4 = vld [vmem:[#allocation5 + $0x40] sm:$0xff]   ;;  %v911_v5 = vld [vmem:[#allocation5 + $0x18] sm:$0xff]   ;;  %vm224_vm2 = vsmask.f32 256 }
  0x59   : > { %813 = vmatprep.mubr.msk.bf16.mxu0 %vm1099_vm0, %v1098_v0  ;;  %793 = vmatprep.mubr.msk.bf16.mxu1 %vm1099_vm0, %v1098_v0  ;;  %v213_v6 = vld [vmem:[%s180_s7] sm:$0xff]  ;;  %v918_v7 = vld [vmem:[#allocation5 + $0x48] sm:$0xff]   ;;  %v912_v8 = vld [vmem:[#allocation5 + $0x20] sm:$0xff]   ;;  %vm230_vm4 = vcmask 1043456   ;;  %vm231_vm5 = vsmask.f32 3328 }
  0x5a   : > { %798 = vmatpush3.bf16.msra.mxu0 %v908_v1  ;;  %778 = vmatpush3.bf16.msra.mxu1 %v916_v4  ;;  %v1282_v9 = vpack.c.bf16 %v213_v6, %v213_v6  ;;  %v920_v10 = vld [vmem:[#allocation5 + $0x50] sm:$0xff]   ;;  %v913_v11 = vld [vmem:[#allocation5 + $0x28] sm:$0xff]   ;;  %v922_v13 = vld [vmem:[#allocation5 + $0x58] sm:$0xff]   ;;  %s746_s18 = sshll.u32 %s1143_s16, 7  ;;  %s204_s20 = scalar_lea.vmem [#allocation7], %s716_s22 }
  0x5b   : > { %799 = vmatprep.subr.bf16.mxu0 %v1098_v0  ;;  %779 = vmatprep.subr.bf16.mxu1 %v1098_v0  ;;  %v914_v14 = vld [vmem:[#allocation5 + $0x30] sm:$0xff]   ;;  %v924_v17 = vld [vmem:[#allocation5 + $0x60] sm:$0xff]   ;;  %v915_v18 = vld [vmem:[#allocation5 + $0x38] sm:$0xff]   ;;  %s584_s4 = sshll.u32 %s204_s20, 4  ;;  %s1313_s5 = scalar_lea.hbm %s1390_s2, %s746_s18  ;;  %s1315_s4 = int_to_ptr.vmem [resolvable:$true] %s584_s4 }
  0x5c   : > { %v216_v12 = vshrl.u32 %v1282_v9, 16  ;;  %v219_v15 = vshll.u32 %v1282_v9, 16  ;;  %v926_v20 = vld [vmem:[#allocation5 + $0x68] sm:$0xff]   ;;  %vm225_vm3 = vmand %vm223_vm1, %vm224_vm2  ;;  %v917_v22 = vld [vmem:[#allocation5 + $0x80] sm:$0xff]   ;;  %s566_s8 = scalar_lea.sflag [#allocation4], %s1258_s30  ;;  %s990_s9 = scalar_lea.vmem %s1315_s4, 128 }
  0x5d   : > { %v928_v23 = vld [vmem:[#allocation5 + $0x70] sm:$0xff]   ;;  %v919_v24 = vld [vmem:[#allocation5 + $0x88] sm:$0xff]   ;;  %v930_v25 = vld [vmem:[#allocation5 + $0x78] sm:$0xff]   ;;  %p991_p4 = scmp.ne.s32.totalorder %s1315_s4, %s990_s9  ;;  %s1100_s10 = smov [#allocation7]  }
  0x5e   : > { %800 = vmatpush3.bf16.msra.mxu0 %v909_v2  ;;  %780 = vmatpush3.bf16.msra.mxu1 %v918_v7  ;;  %v218_v16 = vrot.slane %v216_v12, 7  ;;  %v921_v26 = vld [vmem:[#allocation5 + $0x90] sm:$0xff]   ;;  %v923_v27 = vld [vmem:[#allocation5 + $0x98] sm:$0xff]   ;;  %v925_v28 = vld [vmem:[#allocation5 + $0xa0] sm:$0xff]   ;;  %v227_v31 = vrot.slane %v219_v15, 1  ;;  %s994_s11 = sshll.u32 %s1100_s10, 4  ;;  %s995_s11 = int_to_ptr.vmem [resolvable:$false] %s994_s11 }
  0x5f   : > { %801 = vmatprep.subr.bf16.mxu0 %v1098_v0  ;;  %781 = vmatprep.subr.bf16.mxu1 %v1098_v0  ;;  %v927_v29 = vld [vmem:[#allocation5 + $0xa8] sm:$0xff]   ;;  %v929_v30 = vld [vmem:[#allocation5 + $0xb0] sm:$0xff]   ;;  %v931_v32 = vld [vmem:[#allocation5 + $0xb8] sm:$0xff]   ;;  %p992_p6 = pnand %p991_p4, %p1213_p12  ;;  %s996_s27 = scalar_lea.vmem %s995_s11, 256 }
  0x60   : > { %v221_v19 = vor.u32 %v219_v15, %v218_v16  ;;  %v228_v33 = vor.u32 %v227_v31, %v216_v12  ;;  %vm232_vm6 = vmand %vm230_vm4, %vm231_vm5  ;;  %p997_p10 = scmp.lt.s32.totalorder %s1315_s4, %s995_s11  ;;  %p998_p13 = scmp.lt.s32.totalorder %s996_s27, %s990_s9 }
  0x61   : > { %p993_p8 = pneg %p992_p6 }
  0x62   : > { %802 = vmatpush3.bf16.msra.mxu0 %v910_v3  ;;  %782 = vmatpush3.bf16.msra.mxu1 %v920_v10  ;;  %v226_v21 = vsel %vm225_vm3, 0, %v221_v19  ;;  %v233_v34 = vsel %vm232_vm6, %v228_v33, 0  ;;  %p999_p3 = por %p998_p13, %p997_p10 }
  0x63   : > { %803 = vmatprep.subr.bf16.mxu0 %v1098_v0  ;;  %783 = vmatprep.subr.bf16.mxu1 %v1098_v0 }
  0x64   : > { %p1000_p7 = pnand %p999_p3, %p993_p8 }
  0x66   : > { %804 = vmatpush3.bf16.msra.mxu0 %v911_v5  ;;  %784 = vmatpush3.bf16.msra.mxu1 %v922_v13 }
  0x67   : > { %805 = vmatprep.subr.bf16.mxu0 %v1098_v0  ;;  %785 = vmatprep.subr.bf16.mxu1 %v1098_v0 }
  0x6a   : > { %806 = vmatpush3.bf16.msra.mxu0 %v912_v8  ;;  %786 = vmatpush3.bf16.msra.mxu1 %v924_v17 }
  0x6b   : > { %807 = vmatprep.subr.bf16.mxu0 %v1098_v0  ;;  %787 = vmatprep.subr.bf16.mxu1 %v1098_v0 }
  0x6e   : > { %808 = vmatpush3.bf16.msra.mxu0 %v913_v11  ;;  %788 = vmatpush3.bf16.msra.mxu1 %v926_v20 }
  0x6f   : > { %809 = vmatprep.subr.bf16.mxu0 %v1098_v0  ;;  %789 = vmatprep.subr.bf16.mxu1 %v1098_v0 }
  0x72   : > { %810 = vmatpush3.bf16.msra.mxu0 %v914_v14  ;;  %790 = vmatpush3.bf16.msra.mxu1 %v928_v23 }
  0x73   : > { %811 = vmatprep.subr.bf16.mxu0 %v1098_v0  ;;  %791 = vmatprep.subr.bf16.mxu1 %v1098_v0 }
  0x76   : > { %812 = vmatpush3.bf16.msra.mxu0 %v915_v18  ;;  %792 = vmatpush3.bf16.msra.mxu1 %v930_v25 }
  0x77   : > { %817 = vmatprep.subr.bf16.mxu0 %v1098_v0 }
  0x79   : > { %814 = vmatmul.mubr.bf16.vlgmr.msra.gmra.mrb[0].mxu0 %v226_v21  ;;  %794 = vmatmul.mubr.bf16.vlgmr.msra.gmra.mrb[0].mxu1 %v1282_v9 }
  0x7a   : > { %818 = vmatpush3.bf16.msra.mxu0 %v917_v22  ;;  %833 = vmatprep.mubr.msk.bf16.mxu0 %vm1099_vm0, %v1098_v0 }
  0x7b   : > { %819 = vmatprep.subr.bf16.mxu0 %v1098_v0 }
  0x7e   : > { %820 = vmatpush3.bf16.msra.mxu0 %v919_v24 }
  0x7f   : > { %821 = vmatprep.subr.bf16.mxu0 %v1098_v0 }
  0x82   : > { %822 = vmatpush3.bf16.msra.mxu0 %v921_v26 }
  0x83   : > { %823 = vmatprep.subr.bf16.mxu0 %v1098_v0 }
  0x86   : > { %824 = vmatpush3.bf16.msra.mxu0 %v923_v27 }
  0x87   : > { %825 = vmatprep.subr.bf16.mxu0 %v1098_v0 }
  0x8a   : > { %826 = vmatpush3.bf16.msra.mxu0 %v925_v28 }
  0x8b   : > { %827 = vmatprep.subr.bf16.mxu0 %v1098_v0 }
  0x8e   : > { %828 = vmatpush3.bf16.msra.mxu0 %v927_v29 }
  0x8f   : > { %829 = vmatprep.subr.bf16.mxu0 %v1098_v0 }
  0x92   : > { %830 = vmatpush3.bf16.msra.mxu0 %v929_v30 }
  0x93   : > { %831 = vmatprep.subr.bf16.mxu0 %v1098_v0 }
  0x96   : > { %832 = vmatpush3.bf16.msra.mxu0 %v931_v32 }
  0x99   : > { %834 = vmatmul.mubr.bf16.vlgmr.msra.gmra.mrb[0].mxu0 %v233_v34 }
 0x14c   : > { %v349_v35 = vpop.f32.mrb[0].mxu1 }
 0x14d   : > { %v795_v36 = vpop.f32.mrb[1].mxu1 }
 0x14e   : > { %v352_v37 = vpop.f32.mrb[2].mxu1 }
 0x14f   : > { %v796_v38 = vpop.f32.mrb[3].mxu1 }
 0x16c   : > { %v542_v39 = vpop.f32.mrb[0].mxu0 }
 0x16d   : > { %v837_v40 = vadd.f32 %v542_v39, %v349_v35  ;;  %v835_v41 = vpop.f32.mrb[1].mxu0 }
 0x16e   : > { %v545_v42 = vpop.f32.mrb[2].mxu0 }
 0x16f   : > { %v550_v43 = vrot.slane %v837_v40, 4  ;;  %v557_v44 = vmul.f32 %v837_v40, %v837_v40  ;;  %v836_v45 = vpop.f32.mrb[3].mxu0  ;;  %549 = vst [vmem:[%s204_s20] sm:$0xff] %v837_v40 }
 0x170   : > { %1003 = shalt.err (!%p1000_p7)
}
 0x171   : > { %s1004_s28 = scalar_lea.hbm %s1313_s5, 128  ;;  %s1008_s22 = scalar_lea.hbm %s1390_s2, 256 }
 0x172   : > { %p1005_p9 = scmp.ne.s32.totalorder %s1313_s5, %s1004_s28  ;;  %p1009_p0 = scmp.lt.u32.totalorder %s1313_s5, %s1390_s2 }
 0x173   : > { %p1010_p11 = scmp.lt.u32.totalorder %s1008_s22, %s1004_s28  ;;  %p1012_p4 = scmp.lt.u32.totalorder %s1004_s28, %s1313_s5 }
 0x174   : > { %p1006_p2 = pnand %p1005_p9, %p1213_p12 }
 0x175   : > { %p1011_p1 = por %p1010_p11, %p1009_p0 }
 0x176   : > { %p1007_p5 = pneg %p1006_p2 }
 0x177   : > { %p1013_p6 = por %p1012_p4, %p1011_p1 }
 0x179   : > { %p1014_p8 = pnand %p1013_p6, %p1007_p5 }
 0x17b   : > { %1017 = shalt.err (!%p1014_p8)
}
 0x17c   : > { %848 = dma.vmem_to_hbm [thread:$0]  (%p1213_p12), %s1315_s4, 128, %s1313_s5, %s566_s8   ;;  %v551_v46 = vadd.f32 %v837_v40, %v550_v43  ;;  %v558_v47 = vrot.slane %v557_v44, 4 }
 0x17d   : > { %s719_s18 = sshll.u32 %s1258_s30, 1  ;;  %s747_s20 = sshll.u32 %s1143_s16, 5 }
 0x17e   : > { %v552_v48 = vrot.slane %v551_v46, 2  ;;  %v559_v49 = vadd.f32 %v558_v47, %v557_v44  ;;  %s211_s25 = scalar_lea.vmem [#allocation8], %s719_s18  ;;  %s1344_s5 = scalar_lea.hbm %s1391_s3, %s747_s20 }
 0x17f   : > { %s597_s26 = sshll.u32 %s211_s25, 4  ;;  %s571_s8 = scalar_lea.sflag [#allocation9], %s1258_s30  ;;  %s1346_s26 = int_to_ptr.vmem [resolvable:$true] %s597_s26 }
 0x180   : > { %v553_v50 = vadd.f32 %v552_v48, %v551_v46  ;;  %v560_v51 = vrot.slane %v559_v49, 2  ;;  %s1018_s10 = scalar_lea.vmem %s1346_s26, 32  ;;  %s1101_s16 = smov [#allocation8]  }
 0x181   : > { %p1019_p10 = scmp.ne.s32.totalorder %s1346_s26, %s1018_s10  ;;  %s1022_s11 = sshll.u32 %s1101_s16, 4  ;;  %s1023_s11 = int_to_ptr.vmem [resolvable:$false] %s1022_s11 }
 0x182   : > { %v554_v52 = vrot.slane %v553_v50, 1  ;;  %v561_v53 = vadd.f32 %v560_v51, %v559_v49  ;;  %s1024_s27 = scalar_lea.vmem %s1023_s11, 64  ;;  %p1025_p7 = scmp.lt.s32.totalorder %s1346_s26, %s1023_s11 }
 0x183   : > { %p1020_p13 = pnand %p1019_p10, %p1213_p12  ;;  %p1026_p9 = scmp.lt.s32.totalorder %s1024_s27, %s1018_s10 }
 0x184   : > { %v555_v54 = vadd.f32 %v554_v52, %v553_v50  ;;  %v562_v55 = vrot.slane %v561_v53, 1 }
 0x185   : > { %p1021_p3 = pneg %p1020_p13  ;;  %p1027_p2 = por %p1026_p9, %p1025_p7 }
 0x186   : > { %556 = vst [vmem:[%s211_s25] sm:$0x1] %v555_v54  ;;  %v563_v56 = vadd.f32 %v562_v55, %v561_v53 }
 0x187   : > { %p1028_p5 = pnand %p1027_p2, %p1021_p3 }
 0x188   : > { %564 = vst [vmem:[%s211_s25 + $0x1] sm:$0x1] %v563_v56 }
 0x189   : > { %1031 = shalt.err (!%p1028_p5)
}
 0x18a   : > { %s1032_s30 = scalar_lea.hbm %s1344_s5, 32  ;;  %s1036_s23 = scalar_lea.hbm %s1391_s3, 64 }
 0x18b   : > { %p1033_p0 = scmp.ne.s32.totalorder %s1344_s5, %s1032_s30  ;;  %p1037_p4 = scmp.lt.u32.totalorder %s1344_s5, %s1391_s3 }
 0x18c   : > { %p1038_p6 = scmp.lt.u32.totalorder %s1036_s23, %s1032_s30  ;;  %p1040_p10 = scmp.lt.u32.totalorder %s1032_s30, %s1344_s5 }
 0x18d   : > { %p1034_p11 = pnand %p1033_p0, %p1213_p12 }
 0x18e   : > { %p1039_p8 = por %p1038_p6, %p1037_p4 }
 0x18f   : > { %p1035_p1 = pneg %p1034_p11 }
 0x190   : > { %p1041_p13 = por %p1040_p10, %p1039_p8 }
 0x192   : > { %p1042_p3 = pnand %p1041_p13, %p1035_p1 }
 0x194   : > { %1045 = shalt.err (!%p1042_p3)
}
 0x195   : > { %849 = dma.vmem_to_hbm [thread:$0]  (%p1213_p12), %s1346_s26, 32, %s1344_s5, %s571_s8  }
 0x196 PF: > { %s609_s7 = sand.u32 1, %s1080_s12   ;;  %p1406_p7 = scmp.ne.s32.totalorder %s1396_s19, 0 }
 0x197   : > { %p1407_p9 = scmp.ge.s32.totalorder %s1092_s15, 2  ;;  %s610_s18 = scalar_lea.sflag [#allocation4], %s609_s7 }
 0x199   : > { %p861_p2 = pnand %p1407_p9, %p1406_p7 }
 0x19b   : > { %1071 = dma.done.wait (!%p861_p2), %s610_s18, 128  }
 0x19c   : > { %1073 = vsyncadd (!%p861_p2), %s610_s18, 4294967168  ;;  %s619_s20 = scalar_lea.sflag [#allocation9], %s609_s7 }
 0x19d   : > { %1075 = dma.done.wait (!%p861_p2), %s619_s20, 32  }
 0x19e   : > { %1077 = vsyncadd (!%p861_p2), %s619_s20, 4294967264  ;;  %p21_p12 = scmp.ge.s32.totalorder %s1178_s24, 4   ;;  %s1408_s12 = smov %s1084_s13 }
 0x19f   : > { %s1409_s13 = smov %s1088_s14  ;;  %s1410_s14 = smov %s1209_s17 }
 0x1a0   : > { %s1411_s15 = smov %s1178_s24  ;;  %23 = sbr.rel (!%p21_p12) target bundleno = 8 (0x8), region = 96 }
 0x1a7   :  { %624 = vsyncpa [#allocation3], 1 }
 0x1a8   :  { %626 = vsyncpa [#allocation3 + $0x1], 1 }
 0x1a9   :  { %627 = vsyncpa [#allocation6], 1 }
 0x1aa   :  { %628 = vsyncpa [#allocation4], 1 }
 0x1ab   :  { %630 = vsyncpa [#allocation4 + $0x1], 1 }
 0x1ac   :  { %631 = vsyncpa [#allocation9], 1 }
 0x1ad   :  { %633 = vsyncpa [#allocation9 + $0x1], 1 }

</bundles_post_ra>
